<compile_context>
chip_gen: v7x
topology: tpu7x:2x2x1
jax: 0.10.0
libtpu: 0.0.40
codegen_flags: <defaults>
</compile_context>

<pallas_src>
import jax
import jax.numpy as jnp
from jax.experimental import pallas as pl
from jax.experimental.pallas import tpu as pltpu


def rnn_head_kernel(x_ref, wih_ref, whh_ref, b_ref, wo_ref, bo_ref, out_ref):
    """Single-invocation fused RNN + classifier head.

    x_ref   : (T*B, D) time-major embedded tokens (row index = t*B + b)
    wih_ref : (D, H)   input->hidden weights (pre-transposed)
    whh_ref : (H, H)   hidden->hidden weights (pre-transposed)
    b_ref   : (1, H)   b_ih + b_hh
    wo_ref  : (H, 6)   classifier weights (pre-transposed)
    bo_ref  : (1, 6)   classifier bias
    out_ref : (B, 6)   logits
    """
    TB = x_ref.shape[0]
    B = out_ref.shape[0]
    T = TB // B

    # Hoisted input projection: the x @ W_ih term has no recurrent dependency,
    # so compute it for all T steps with one MXU matmul (+ fused bias).
    xw = (jnp.dot(x_ref[...], wih_ref[...], preferred_element_type=jnp.float32)
          + b_ref[...])                                     # (T*B, H)

    whh = whh_ref[...]                                      # loaded once

    # t = 0: h_prev == 0, so the recurrent matmul vanishes.
    h = jnp.tanh(xw[0:B, :])

    # Remaining steps, statically unrolled (T is small and known at trace time).
    # Slices of xw are static and sublane-aligned (B == 8), so each iteration is
    # just one (B, H) @ (H, H) vmatmul, a VPU add, and an EUP tanh.
    for t in range(1, T):
        h = jnp.tanh(xw[t * B:(t + 1) * B, :]
                     + jnp.dot(h, whh, preferred_element_type=jnp.float32))

    # Classifier head on the final hidden state (executes once; the lane dim of 6
    # produces a single masked store, which is fine at once-per-kernel frequency).
    logits = (jnp.dot(h, wo_ref[...], preferred_element_type=jnp.float32)
              + bo_ref[...])
    out_ref[...] = logits.astype(out_ref.dtype)


def torch_model_forward(x_ids, params):
    """Equivalent of TorchModel.forward(x) (inference branch, y=None)."""
    emb_table = params["embedding"]        # (V, D), row 0 == 0 (padding_idx=0)
    w_ih = params["w_ih"]                  # (D, H)
    w_hh = params["w_hh"]                  # (H, H)
    b = params["b"]                        # (1, H)
    w_out = params["w_out"]                # (H, 6)
    b_out = params["b_out"]                # (1, 6)

    B, T = x_ids.shape
    D = emb_table.shape[1]

    # Embedding lookup (gather) in plain JAX glue; padding_idx=0 handled by
    # keeping row 0 of the table zero.  Gathering with x_ids.T makes the slab
    # time-major, so flattening to (T*B, D) is a free contiguous reshape and the
    # kernel never needs an activation transpose or sublane gather.
    x_tm = jnp.take(emb_table, x_ids.T, axis=0).reshape(T * B, D)

    out = pl.pallas_call(
        rnn_head_kernel,
        out_shape=jax.ShapeDtypeStruct((B, 6), jnp.float32),
        # Single invocation (no grid): every operand is a full-array VMEM block,
        # loaded exactly once with no pipelining/double-buffering overhead.
        in_specs=[pl.BlockSpec(memory_space=pltpu.MemorySpace.VMEM)
                  for _ in range(6)],
        out_specs=pl.BlockSpec(memory_space=pltpu.MemorySpace.VMEM),
    )(x_tm, w_ih, w_hh, b, w_out, b_out)
    return out


def init_params(key, vocab_size, vector_dim, hidden_size):
    k_emb, k_ih, k_hh, k_bih, k_bhh, k_w, k_b = jax.random.split(key, 7)
    bound_rnn = 1.0 / jnp.sqrt(hidden_size)
    bound_lin = 1.0 / jnp.sqrt(hidden_size)

    emb = jax.random.normal(k_emb, (vocab_size, vector_dim), jnp.float32)
    emb = emb.at[0].set(0.0)                              # padding_idx=0

    w_ih = jax.random.uniform(k_ih, (vector_dim, hidden_size), jnp.float32,
                              -bound_rnn, bound_rnn)
    w_hh = jax.random.uniform(k_hh, (hidden_size, hidden_size), jnp.float32,
                              -bound_rnn, bound_rnn)
    b_ih = jax.random.uniform(k_bih, (hidden_size,), jnp.float32,
                              -bound_rnn, bound_rnn)
    b_hh = jax.random.uniform(k_bhh, (hidden_size,), jnp.float32,
                              -bound_rnn, bound_rnn)
    w_out = jax.random.uniform(k_w, (hidden_size, 6), jnp.float32,
                               -bound_lin, bound_lin)
    b_out = jax.random.uniform(k_b, (6,), jnp.float32, -bound_lin, bound_lin)

    return {
        "embedding": emb,
        "w_ih": w_ih,
        "w_hh": w_hh,
        "b": (b_ih + b_hh).reshape(1, hidden_size),
        "w_out": w_out,
        "b_out": b_out.reshape(1, 6),
    }


def reference_forward(x_ids, params):
    """Pure-JAX reference of the PyTorch forward (for verification)."""
    x_emb = jnp.take(params["embedding"], x_ids, axis=0)   # (B, T, D)
    B, T, D = x_emb.shape
    H = params["w_hh"].shape[0]
    h = jnp.zeros((B, H), jnp.float32)
    for t in range(T):
        h = jnp.tanh(x_emb[:, t, :] @ params["w_ih"]
                     + h @ params["w_hh"] + params["b"])
    return h @ params["w_out"] + params["b_out"]


if __name__ == "__main__":
    # Small shapes: vocab=30, vector_dim=32, hidden_size=64, batch=8, seq=8
    VOCAB, D, H, B, T = 30, 32, 64, 8, 8

    key = jax.random.PRNGKey(0)
    k_params, k_x = jax.random.split(key)
    params = init_params(k_params, VOCAB, D, H)
    x_ids = jax.random.randint(k_x, (B, T), 0, VOCAB, dtype=jnp.int32)

    y_pred = jax.jit(torch_model_forward)(x_ids, params)
    y_pred = jax.block_until_ready(y_pred)

    y_ref = reference_forward(x_ids, params)
    assert y_pred.shape == (B, 6)
    assert jnp.allclose(y_pred, y_ref, atol=1e-5, rtol=1e-5)

    # NOTE(v7x): the kernel is a single sequential invocation, so the second
    # TensorCore is idle; shard a leading batch grid axis if B ever grows large.
    # TODO(synk): CrossEntropyLoss (training branch, y is not None) not implemented;
    # only the inference path returning y_pred is kernelized.
    print("KERNEL_OK")
</pallas_src>

<mosaic_0001>
module attributes {stable_mosaic.version = 11 : i64} {
  func.func @rnn_head_kernel(%arg0: memref<64x32xf32, #tpu.memory_space<vmem>>, %arg1: memref<32x64xf32, #tpu.memory_space<vmem>>, %arg2: memref<64x64xf32, #tpu.memory_space<vmem>>, %arg3: memref<1x64xf32, #tpu.memory_space<vmem>>, %arg4: memref<64x6xf32, #tpu.memory_space<vmem>>, %arg5: memref<1x6xf32, #tpu.memory_space<vmem>>, %arg6: memref<8x6xf32, #tpu.memory_space<vmem>>) attributes {dimension_semantics = [], scalar_prefetch = 0 : i64, scratch_operands = 0 : i64, tpu.core_type = #tpu.core_type<tc>} {
    %c0 = arith.constant 0 : index
    %c0_0 = arith.constant 0 : index
    %0 = vector.load %arg0[%c0, %c0_0] : memref<64x32xf32, #tpu.memory_space<vmem>>, vector<64x32xf32>
    %c0_1 = arith.constant 0 : index
    %c0_2 = arith.constant 0 : index
    %1 = vector.load %arg1[%c0_1, %c0_2] : memref<32x64xf32, #tpu.memory_space<vmem>>, vector<32x64xf32>
    %cst = arith.constant dense<0.000000e+00> : vector<64x64xf32>
    %2 = tpu.matmul %0, %1, %cst {dimension_numbers = #tpu.dot_dimension_numbers<[1], [0], [0], [1], [0, 0, 1, 1], [], []>} : vector<64x32xf32>, vector<32x64xf32>, vector<64x64xf32> -> vector<64x64xf32>
    %c0_3 = arith.constant 0 : index
    %c0_4 = arith.constant 0 : index
    %3 = vector.load %arg3[%c0_3, %c0_4] : memref<1x64xf32, #tpu.memory_space<vmem>>, vector<1x64xf32>
    %4 = vector.broadcast %3 : vector<1x64xf32> to vector<64x64xf32>
    %5 = arith.addf %2, %4 : vector<64x64xf32>
    %c0_5 = arith.constant 0 : index
    %c0_6 = arith.constant 0 : index
    %6 = vector.load %arg2[%c0_5, %c0_6] : memref<64x64xf32, #tpu.memory_space<vmem>>, vector<64x64xf32>
    %7 = vector.extract_strided_slice %5 {offsets = [0, 0], sizes = [8, 64], strides = [1, 1]} : vector<64x64xf32> to vector<8x64xf32>
    %8 = math.tanh %7 : vector<8x64xf32>
    %9 = vector.extract_strided_slice %5 {offsets = [8, 0], sizes = [8, 64], strides = [1, 1]} : vector<64x64xf32> to vector<8x64xf32>
    %cst_7 = arith.constant dense<0.000000e+00> : vector<8x64xf32>
    %10 = tpu.matmul %8, %6, %cst_7 {dimension_numbers = #tpu.dot_dimension_numbers<[1], [0], [0], [1], [0, 0, 1, 1], [], []>} : vector<8x64xf32>, vector<64x64xf32>, vector<8x64xf32> -> vector<8x64xf32>
    %11 = arith.addf %9, %10 : vector<8x64xf32>
    %12 = math.tanh %11 : vector<8x64xf32>
    %13 = vector.extract_strided_slice %5 {offsets = [16, 0], sizes = [8, 64], strides = [1, 1]} : vector<64x64xf32> to vector<8x64xf32>
    %cst_8 = arith.constant dense<0.000000e+00> : vector<8x64xf32>
    %14 = tpu.matmul %12, %6, %cst_8 {dimension_numbers = #tpu.dot_dimension_numbers<[1], [0], [0], [1], [0, 0, 1, 1], [], []>} : vector<8x64xf32>, vector<64x64xf32>, vector<8x64xf32> -> vector<8x64xf32>
    %15 = arith.addf %13, %14 : vector<8x64xf32>
    %16 = math.tanh %15 : vector<8x64xf32>
    %17 = vector.extract_strided_slice %5 {offsets = [24, 0], sizes = [8, 64], strides = [1, 1]} : vector<64x64xf32> to vector<8x64xf32>
    %cst_9 = arith.constant dense<0.000000e+00> : vector<8x64xf32>
    %18 = tpu.matmul %16, %6, %cst_9 {dimension_numbers = #tpu.dot_dimension_numbers<[1], [0], [0], [1], [0, 0, 1, 1], [], []>} : vector<8x64xf32>, vector<64x64xf32>, vector<8x64xf32> -> vector<8x64xf32>
    %19 = arith.addf %17, %18 : vector<8x64xf32>
    %20 = math.tanh %19 : vector<8x64xf32>
    %21 = vector.extract_strided_slice %5 {offsets = [32, 0], sizes = [8, 64], strides = [1, 1]} : vector<64x64xf32> to vector<8x64xf32>
    %cst_10 = arith.constant dense<0.000000e+00> : vector<8x64xf32>
    %22 = tpu.matmul %20, %6, %cst_10 {dimension_numbers = #tpu.dot_dimension_numbers<[1], [0], [0], [1], [0, 0, 1, 1], [], []>} : vector<8x64xf32>, vector<64x64xf32>, vector<8x64xf32> -> vector<8x64xf32>
    %23 = arith.addf %21, %22 : vector<8x64xf32>
    %24 = math.tanh %23 : vector<8x64xf32>
    %25 = vector.extract_strided_slice %5 {offsets = [40, 0], sizes = [8, 64], strides = [1, 1]} : vector<64x64xf32> to vector<8x64xf32>
    %cst_11 = arith.constant dense<0.000000e+00> : vector<8x64xf32>
    %26 = tpu.matmul %24, %6, %cst_11 {dimension_numbers = #tpu.dot_dimension_numbers<[1], [0], [0], [1], [0, 0, 1, 1], [], []>} : vector<8x64xf32>, vector<64x64xf32>, vector<8x64xf32> -> vector<8x64xf32>
    %27 = arith.addf %25, %26 : vector<8x64xf32>
    %28 = math.tanh %27 : vector<8x64xf32>
    %29 = vector.extract_strided_slice %5 {offsets = [48, 0], sizes = [8, 64], strides = [1, 1]} : vector<64x64xf32> to vector<8x64xf32>
    %cst_12 = arith.constant dense<0.000000e+00> : vector<8x64xf32>
    %30 = tpu.matmul %28, %6, %cst_12 {dimension_numbers = #tpu.dot_dimension_numbers<[1], [0], [0], [1], [0, 0, 1, 1], [], []>} : vector<8x64xf32>, vector<64x64xf32>, vector<8x64xf32> -> vector<8x64xf32>
    %31 = arith.addf %29, %30 : vector<8x64xf32>
    %32 = math.tanh %31 : vector<8x64xf32>
    %33 = vector.extract_strided_slice %5 {offsets = [56, 0], sizes = [8, 64], strides = [1, 1]} : vector<64x64xf32> to vector<8x64xf32>
    %cst_13 = arith.constant dense<0.000000e+00> : vector<8x64xf32>
    %34 = tpu.matmul %32, %6, %cst_13 {dimension_numbers = #tpu.dot_dimension_numbers<[1], [0], [0], [1], [0, 0, 1, 1], [], []>} : vector<8x64xf32>, vector<64x64xf32>, vector<8x64xf32> -> vector<8x64xf32>
    %35 = arith.addf %33, %34 : vector<8x64xf32>
    %36 = math.tanh %35 : vector<8x64xf32>
    %c0_14 = arith.constant 0 : index
    %c0_15 = arith.constant 0 : index
    %37 = vector.load %arg4[%c0_14, %c0_15] : memref<64x6xf32, #tpu.memory_space<vmem>>, vector<64x6xf32>
    %cst_16 = arith.constant dense<0.000000e+00> : vector<8x6xf32>
    %38 = tpu.matmul %36, %37, %cst_16 {dimension_numbers = #tpu.dot_dimension_numbers<[1], [0], [0], [1], [0, 0, 1, 1], [], []>} : vector<8x64xf32>, vector<64x6xf32>, vector<8x6xf32> -> vector<8x6xf32>
    %c0_17 = arith.constant 0 : index
    %c0_18 = arith.constant 0 : index
    %39 = vector.load %arg5[%c0_17, %c0_18] : memref<1x6xf32, #tpu.memory_space<vmem>>, vector<1x6xf32>
    %40 = vector.broadcast %39 : vector<1x6xf32> to vector<8x6xf32>
    %41 = arith.addf %38, %40 : vector<8x6xf32>
    %c0_19 = arith.constant 0 : index
    %c0_20 = arith.constant 0 : index
    %42 = vector.load %arg6[%c0_19, %c0_20] : memref<8x6xf32, #tpu.memory_space<vmem>>, vector<8x6xf32>
    tpu.vector_store %arg6[%c0_19, %c0_20], %41 {strides = array<i32>} : memref<8x6xf32, #tpu.memory_space<vmem>>, vector<8x6xf32>,
    return
  }
}

</mosaic_0001>

<bundles_post_ra>
// kernel: torch_model_forward.1
= control target key start
LH: loop header
LB: loop body
LE: loop exit
PB: predicated region body
PF: predicated region fallthrough
CT: control target
= control target key end

     0   :  { %vm43_vm0 = vcmask 261120   ;;  %v1234_v6 = vmov 0.0|0.0   ;;  %s1488_s0 = inlined_call_operand.vmem [shape: f32[64,32], index: 0, kind: input, shape index: {}]   ;;  %s1489_s1 = inlined_call_operand.vmem [shape: f32[32,64], index: 1, kind: input, shape index: {}]   ;;  %s1490_s2 = inlined_call_operand.vmem [shape: f32[64,64], index: 2, kind: input, shape index: {}]   ;;  %s1491_s3 = inlined_call_operand.vmem [shape: f32[1,64], index: 3, kind: input, shape index: {}]   ;;  %s1492_s4 = inlined_call_operand.vmem [shape: f32[64,6], index: 4, kind: input, shape index: {}]   ;;  %s1493_s5 = inlined_call_operand.vmem [shape: f32[1,6], index: 5, kind: input, shape index: {}]   ;;  %s1494_s6 = inlined_call_operand.hbm [shape: f32[8,6], index: 6, kind: output, shape index: {}]  }
   0x1   :  { %v32_v0 = vld [vmem:[%s1489_s1] sm:$0xff]  ;;  %v33_v1 = vld [vmem:[%s1489_s1 + $0x8] sm:$0xff]  ;;  %v34_v2 = vld [vmem:[%s1489_s1 + $0x10] sm:$0xff]  ;;  %1094 = vmatprep.subr.bf16.mxu1 %v1234_v6 }
   0x2   :  { %v1086_v3 = vpack.c.bf16 %v33_v1, %v32_v0  ;;  %v35_v4 = vld [vmem:[%s1489_s1 + $0x18] sm:$0xff]  ;;  %v24_v5 = vld [vmem:[%s1488_s0] sm:$0xff] }
   0x3   :  { %v1090_v7 = vpack.c.bf16 %v35_v4, %v34_v2  ;;  %922 = vmatprep.mubr.msk.f32.mxu0 %vm43_vm0, %v24_v5 }
   0x4   :  { %11 = vsyncpa [#allocation3], 0  ;;  %1087 = vmatprep.subr.bf16.mxu0 %v1086_v3  ;;  %v25_v8 = vld [vmem:[%s1488_s0 + $0x8] sm:$0xff]  ;;  %v173_v9 = vld [vmem:[%s1490_s2] sm:$0xff]  ;;  %vm1235_vm1 = vmmov 0   ;;  %v1236_v20 = vmov 0.0  }
   0x5   :  { %1089 = vmatpush3.bf16.msra.mxu0 %v1086_v3  ;;  %v174_v10 = vld [vmem:[%s1490_s2 + $0x8] sm:$0xff]  ;;  %v175_v12 = vld [vmem:[%s1490_s2 + $0x10] sm:$0xff]  ;;  %v176_v13 = vld [vmem:[%s1490_s2 + $0x18] sm:$0xff]  ;;  %950 = vmatprep.mubr.msk.f32.mxu1 %vm1235_vm1, %v1236_v20  ;;  %vm182_vm2 = vcmask 523264   ;;  %vm796_vm3 = vcmask 48128  }
   0x6   :  { %1091 = vmatprep.subr.bf16.mxu0 %v1090_v7  ;;  %v1301_v11 = vpack.c.bf16 %v174_v10, %v173_v9  ;;  %v1313_v14 = vpack.c.bf16 %v176_v13, %v175_v12  ;;  %v177_v15 = vld [vmem:[%s1490_s2 + $0x20] sm:$0xff]  ;;  %v178_v16 = vld [vmem:[%s1490_s2 + $0x28] sm:$0xff]  ;;  %v179_v18 = vld [vmem:[%s1490_s2 + $0x30] sm:$0xff] }
   0x7   :  { %v1324_v17 = vpack.c.bf16 %v178_v16, %v177_v15  ;;  %v180_v19 = vld [vmem:[%s1490_s2 + $0x38] sm:$0xff]  ;;  %v26_v22 = vld [vmem:[%s1488_s0 + $0x10] sm:$0xff]  ;;  %v1352_v23 = vld [vmem:[%s1491_s3] ss:$0 sm:$0xff] }
   0x8   :  { %1096 = vmatpush3.bf16.msra.mxu1 %v1301_v11  ;;  %v1336_v21 = vpack.c.bf16 %v180_v19, %v179_v18  ;;  %v27_v28 = vld [vmem:[%s1488_s0 + $0x18] sm:$0xff]  ;;  %v28_v29 = vld [vmem:[%s1488_s0 + $0x20] sm:$0xff]  ;;  %v29_v30 = vld [vmem:[%s1488_s0 + $0x28] sm:$0xff] }
   0x9   :  { %1093 = vmatpush3.bf16.msra.mxu0 %v1090_v7  ;;  %1097 = vmatprep.subr.bf16.mxu1 %v1234_v6  ;;  %v30_v31 = vld [vmem:[%s1488_s0 + $0x30] sm:$0xff]  ;;  %v31_v32 = vld [vmem:[%s1488_s0 + $0x38] sm:$0xff]  ;;  %v708_v0 = vld [vmem:[%s1492_s4] sm:$0xff] }
   0xa   :  { %1106 = vmatprep.subr.bf16.mxu0 %v1234_v6  ;;  %v709_v1 = vld [vmem:[%s1492_s4 + $0x8] sm:$0xff]  ;;  %v710_v9 = vld [vmem:[%s1492_s4 + $0x10] sm:$0xff]  ;;  %v711_v10 = vld [vmem:[%s1492_s4 + $0x18] sm:$0xff] }
   0xb   :  { %v1179_v2 = vpack.c.bf16 %v709_v1, %v708_v0  ;;  %v712_v12 = vld [vmem:[%s1492_s4 + $0x20] sm:$0xff]  ;;  %v713_v13 = vld [vmem:[%s1492_s4 + $0x28] sm:$0xff]  ;;  %v714_v15 = vld [vmem:[%s1492_s4 + $0x30] sm:$0xff] }
   0xc   :  { %923 = vmatmul.mubr.msk.f32.vlgmr.msra.gmra.mrb[0].mxu0 %vm43_vm0, %v25_v8  ;;  %1099 = vmatpush3.bf16.msra.mxu1 %v1313_v14  ;;  %v715_v16 = vld [vmem:[%s1492_s4 + $0x38] sm:$0xff]  ;;  %s1237_s4 = smov [#allocation2]  }
   0xd   :  { %1108 = vmatpush3.bf16.msra.mxu0 %v1301_v11  ;;  %1100 = vmatprep.subr.bf16.mxu1 %v1234_v6  ;;  %s804_s3 = sshll.u32 %s1237_s4, 4  ;;  %s805_s3 = int_to_ptr.vmem [resolvable:$true] %s804_s3 }
   0xe   :  { %1109 = vmatprep.subr.bf16.mxu0 %v1234_v6  ;;  %925 = vmatprep.mubr.msk.f32.mxu0 %vm43_vm0, %v26_v22  ;;  %s1210_s27 = scalar_lea.vmem %s805_s3, 128  ;;  %p1215_p1 = scmp.lt.s32.totalorder %s805_s3, %s805_s3 }
   0xf   :  { %p1211_p0 = scmp.ne.s32.totalorder %s805_s3, %s1210_s27  ;;  %p1216_p2 = scmp.lt.s32.totalorder %s1210_s27, %s1210_s27 }
  0x10   :  { %1102 = vmatpush3.bf16.msra.mxu1 %v1324_v17  ;;  %926 = vmatmul.mubr.msk.f32.gmra.mrb[2].mxu0 %vm43_vm0, %v27_v28 }
  0x11   :  { %1111 = vmatpush3.bf16.msra.mxu0 %v1313_v14  ;;  %1103 = vmatprep.subr.bf16.mxu1 %v1234_v6  ;;  %p1217_p3 = por %p1216_p2, %p1215_p1 }
  0x12   :  { %1112 = vmatprep.subr.bf16.mxu0 %v1234_v6  ;;  %928 = vmatprep.mubr.msk.f32.mxu0 %vm43_vm0, %v28_v29 }
  0x13   :  { %p1218_p4 = pnand %p1217_p3, %p1211_p0 }
  0x14   :  { %1105 = vmatpush3.bf16.msra.mxu1 %v1336_v21  ;;  %929 = vmatmul.mubr.msk.f32.gmra.mrb[4].mxu0 %vm43_vm0, %v29_v30 }
  0x15   :  { %1114 = vmatpush3.bf16.msra.mxu0 %v1324_v17  ;;  %1118 = vmatprep.subr.bf16.mxu1 %v1234_v6 }
  0x16   :  { %1115 = vmatprep.subr.bf16.mxu0 %v1234_v6  ;;  %931 = vmatprep.mubr.msk.f32.mxu0 %vm43_vm0, %v30_v31 }
  0x18   :  { %932 = vmatmul.mubr.msk.f32.gmra.mrb[6].mxu0 %vm43_vm0, %v31_v32 }
  0x19   :  { %1117 = vmatpush3.bf16.msra.mxu0 %v1336_v21  ;;  %969 = vmatprep.mubr.msk.f32.mxu0 %vm1235_vm1, %v1236_v20 }
  0x1a   :  { %1130 = vmatprep.subr.bf16.mxu0 %v1234_v6 }
  0xdf   :  { %v924_v24 = vpop.f32.mrb[0].mxu0 }
  0xe0   :  { %v134_v25 = vpop.f32.mrb[1].mxu0  ;;  %v140_v33 = vadd.f32 %v924_v24, %v1352_v23  ;;  %v828_v24 = vld [vmem:[%s1493_s5] ss:$0 sm:$0xff] }
  0xe1   :  { %v135_v26 = vadd.f32 %v1352_v23, %v134_v25 }
  0xe3   :  { %1194 = vtanh.f32 %v135_v26  ;;  %v927_v38 = vpop.f32.mrb[2].mxu0 }
  0xe4   :  { %v144_v39 = vpop.f32.mrb[3].mxu0  ;;  %v150_v49 = vadd.f32 %v927_v38, %v1352_v23 }
  0xe5   :  { %v145_v44 = vadd.f32 %v1352_v23, %v144_v39 }
  0xe7   :  { %v930_v40 = vpop.f32.mrb[4].mxu0 }
  0xe8   :  { %v154_v41 = vpop.f32.mrb[5].mxu0  ;;  %v160_v59 = vadd.f32 %v930_v40, %v1352_v23 }
  0xe9   :  { %v155_v54 = vadd.f32 %v1352_v23, %v154_v41 }
  0xeb   :  { %v1400_v42 = vpop.f32.mrb[6].mxu0 }
  0xec   :  { %v164_v43 = vpop.f32.mrb[7].mxu0  ;;  %v170_v18 = vadd.f32 %v1400_v42, %v1352_v23 }
  0xed   :  { %v1195_v27 = vpop.eup %1194  ;;  %v165_v3 = vadd.f32 %v1352_v23, %v164_v43 }
  0xee   :  { %951 = vmatmul.mubr.msk.f32.vlgmr.msra.gmra.mrb[0].mxu1 %vm182_vm2, %v1195_v27 }
  0xef   :  { %1120 = vmatpush3.bf16.msra.mxu1 %v1301_v11  ;;  %988 = vmatprep.mubr.msk.f32.mxu1 %vm1235_vm1, %v1236_v20 }
  0xf0   :  { %1121 = vmatprep.subr.bf16.mxu1 %v1234_v6 }
  0xf3   :  { %1123 = vmatpush3.bf16.msra.mxu1 %v1313_v14 }
  0xf4   :  { %1124 = vmatprep.subr.bf16.mxu1 %v1234_v6 }
  0xf7   :  { %1126 = vmatpush3.bf16.msra.mxu1 %v1324_v17 }
  0xf8   :  { %1127 = vmatprep.subr.bf16.mxu1 %v1234_v6 }
  0xfb   :  { %1129 = vmatpush3.bf16.msra.mxu1 %v1336_v21 }
  0xfc   :  { %1142 = vmatprep.subr.bf16.mxu1 %v1234_v6 }
 0x1c1   :  { %v252_v34 = vpop.f32.mrb[0].mxu1 }
 0x1c2   :  { %v256_v35 = vadd.f32 %v252_v34, %v140_v33  ;;  %v952_v36 = vpop.f32.mrb[1].mxu1 }
 0x1c4   :  { %1196 = vtanh.f32 %v256_v35 }
 0x1ce   :  { %v1197_v37 = vpop.eup %1196 }
 0x1cf   :  { %970 = vmatmul.mubr.msk.f32.vlgmr.msra.gmra.mrb[8].mxu0 %vm182_vm2, %v1197_v37 }
 0x1d0   :  { %1132 = vmatpush3.bf16.msra.mxu0 %v1301_v11  ;;  %1007 = vmatprep.mubr.msk.f32.mxu0 %vm1235_vm1, %v1236_v20 }
 0x1d1   :  { %1133 = vmatprep.subr.bf16.mxu0 %v1234_v6 }
 0x1d4   :  { %1135 = vmatpush3.bf16.msra.mxu0 %v1313_v14 }
 0x1d5   :  { %1136 = vmatprep.subr.bf16.mxu0 %v1234_v6 }
 0x1d8   :  { %1138 = vmatpush3.bf16.msra.mxu0 %v1324_v17 }
 0x1d9   :  { %1139 = vmatprep.subr.bf16.mxu0 %v1234_v6 }
 0x1dc   :  { %1141 = vmatpush3.bf16.msra.mxu0 %v1336_v21 }
 0x1dd   :  { %1154 = vmatprep.subr.bf16.mxu0 %v1234_v6 }
 0x2a2   :  { %v327_v45 = vpop.f32.mrb[8].mxu0 }
 0x2a3   :  { %v331_v46 = vadd.f32 %v327_v45, %v145_v44  ;;  %v971_v47 = vpop.f32.mrb[9].mxu0 }
 0x2a5   :  { %1198 = vtanh.f32 %v331_v46 }
 0x2af   :  { %v1199_v48 = vpop.eup %1198 }
 0x2b0   :  { %989 = vmatmul.mubr.msk.f32.vlgmr.msra.gmra.mrb[2].mxu1 %vm182_vm2, %v1199_v48 }
 0x2b1   :  { %1144 = vmatpush3.bf16.msra.mxu1 %v1301_v11  ;;  %1026 = vmatprep.mubr.msk.f32.mxu1 %vm1235_vm1, %v1236_v20 }
 0x2b2   :  { %1145 = vmatprep.subr.bf16.mxu1 %v1234_v6 }
 0x2b5   :  { %1147 = vmatpush3.bf16.msra.mxu1 %v1313_v14 }
 0x2b6   :  { %1148 = vmatprep.subr.bf16.mxu1 %v1234_v6 }
 0x2b9   :  { %1150 = vmatpush3.bf16.msra.mxu1 %v1324_v17 }
 0x2ba   :  { %1151 = vmatprep.subr.bf16.mxu1 %v1234_v6 }
 0x2bd   :  { %1153 = vmatpush3.bf16.msra.mxu1 %v1336_v21 }
 0x2be   :  { %1166 = vmatprep.subr.bf16.mxu1 %v1234_v6 }
 0x383   :  { %v402_v50 = vpop.f32.mrb[2].mxu1 }
 0x384   :  { %v406_v51 = vadd.f32 %v402_v50, %v150_v49  ;;  %v990_v52 = vpop.f32.mrb[3].mxu1 }
 0x386   :  { %1200 = vtanh.f32 %v406_v51 }
 0x390   :  { %v1201_v53 = vpop.eup %1200 }
 0x391   :  { %1008 = vmatmul.mubr.msk.f32.vlgmr.msra.gmra.mrb[10].mxu0 %vm182_vm2, %v1201_v53 }
 0x392   :  { %1156 = vmatpush3.bf16.msra.mxu0 %v1301_v11  ;;  %1045 = vmatprep.mubr.msk.f32.mxu0 %vm1235_vm1, %v1236_v20 }
 0x393   :  { %1157 = vmatprep.subr.bf16.mxu0 %v1234_v6 }
 0x396   :  { %1159 = vmatpush3.bf16.msra.mxu0 %v1313_v14 }
 0x397   :  { %1160 = vmatprep.subr.bf16.mxu0 %v1234_v6 }
 0x39a   :  { %1162 = vmatpush3.bf16.msra.mxu0 %v1324_v17 }
 0x39b   :  { %1163 = vmatprep.subr.bf16.mxu0 %v1234_v6 }
 0x39e   :  { %1165 = vmatpush3.bf16.msra.mxu0 %v1336_v21 }
 0x39f   :  { %1178 = vmatprep.subr.bf16.mxu0 %v1234_v6 }
 0x464   :  { %v477_v55 = vpop.f32.mrb[10].mxu0 }
 0x465   :  { %v481_v56 = vadd.f32 %v477_v55, %v155_v54  ;;  %v1009_v57 = vpop.f32.mrb[11].mxu0 }
 0x467   :  { %1202 = vtanh.f32 %v481_v56 }
 0x471   :  { %v1203_v58 = vpop.eup %1202 }
 0x472   :  { %1027 = vmatmul.mubr.msk.f32.vlgmr.msra.gmra.mrb[4].mxu1 %vm182_vm2, %v1203_v58 }
 0x473   :  { %1168 = vmatpush3.bf16.msra.mxu1 %v1301_v11  ;;  %1064 = vmatprep.mubr.msk.f32.mxu1 %vm1235_vm1, %v1236_v20  ;;  %v1182_v11 = vpack.c.bf16 %v711_v10, %v710_v9 }
 0x474   :  { %1169 = vmatprep.subr.bf16.mxu1 %v1234_v6 }
 0x477   :  { %1171 = vmatpush3.bf16.msra.mxu1 %v1313_v14  ;;  %v1185_v14 = vpack.c.bf16 %v713_v13, %v712_v12 }
 0x478   :  { %1172 = vmatprep.subr.bf16.mxu1 %v1234_v6 }
 0x47b   :  { %1174 = vmatpush3.bf16.msra.mxu1 %v1324_v17  ;;  %v1188_v17 = vpack.c.bf16 %v715_v16, %v714_v15 }
 0x47c   :  { %1175 = vmatprep.subr.bf16.mxu1 %v1234_v6 }
 0x47f   :  { %1177 = vmatpush3.bf16.msra.mxu1 %v1336_v21 }
 0x545   :  { %v552_v60 = vpop.f32.mrb[4].mxu1 }
 0x546   :  { %v556_v61 = vadd.f32 %v552_v60, %v160_v59  ;;  %v1028_v62 = vpop.f32.mrb[5].mxu1 }
 0x548   :  { %1204 = vtanh.f32 %v556_v61 }
 0x552   :  { %v1205_v63 = vpop.eup %1204 }
 0x553   :  { %1046 = vmatmul.mubr.msk.f32.vlgmr.msra.gmra.mrb[12].mxu0 %vm182_vm2, %v1205_v63 }
 0x554   :  { %1083 = vmatprep.mubr.msk.f32.mxu0 %vm1235_vm1, %v1236_v20  ;;  %1180 = vmatpush3.bf16.msra.mxu0 %v1179_v2 }
 0x555   :  { %1181 = vmatprep.subr.bf16.mxu0 %v1234_v6 }
 0x558   :  { %1183 = vmatpush3.bf16.msra.mxu0 %v1182_v11 }
 0x559   :  { %1184 = vmatprep.subr.bf16.mxu0 %v1234_v6 }
 0x55c   :  { %1186 = vmatpush3.bf16.msra.mxu0 %v1185_v14 }
 0x55d   :  { %1187 = vmatprep.subr.bf16.mxu0 %v1234_v6 }
 0x560   :  { %1189 = vmatpush3.bf16.msra.mxu0 %v1188_v17 }
 0x626   :  { %v627_v4 = vpop.f32.mrb[12].mxu0 }
 0x627   :  { %v631_v5 = vadd.f32 %v627_v4, %v165_v3  ;;  %v1047_v7 = vpop.f32.mrb[13].mxu0 }
 0x629   :  { %1206 = vtanh.f32 %v631_v5 }
 0x633   :  { %v1207_v8 = vpop.eup %1206 }
 0x634   :  { %1065 = vmatmul.mubr.msk.f32.vlgmr.msra.gmra.mrb[6].mxu1 %vm182_vm2, %v1207_v8 }
 0x707   :  { %v702_v19 = vpop.f32.mrb[6].mxu1 }
 0x708   :  { %v706_v20 = vadd.f32 %v702_v19, %v170_v18  ;;  %v1066_v21 = vpop.f32.mrb[7].mxu1 }
 0x70a   :  { %1208 = vtanh.f32 %v706_v20 }
 0x714   :  { %v1209_v22 = vpop.eup %1208 }
 0x715   :  { %1084 = vmatmul.mubr.msk.f32.vlgmr.msra.gmra.mrb[14].mxu0 %vm182_vm2, %v1209_v22 }
 0x7e8   :  { %v792_v25 = vpop.f32.mrb[14].mxu0 }
 0x7e9   :  { %v793_v6 = vadd.f32 %v828_v24, %v792_v25  ;;  %v1085_v26 = vpop.f32.mrb[15].mxu0 }
 0x7eb   :  { %797 = vst.msk [vmem:[#allocation2] sm:$0xff] %vm796_vm3, %v793_v6 }
 0x7ec   :  { %1221 = shalt.err (!%p1218_p4)
}
 0x7ed   :  { %s1222_s30 = scalar_lea.hbm %s1494_s6, 128 }
 0x7ee   :  { %p1223_p5 = scmp.ne.s32.totalorder %s1494_s6, %s1222_s30  ;;  %p1226_p6 = scmp.lt.u32.totalorder %s1222_s30, %s1494_s6 }
 0x7f0   :  { %p1228_p7 = pnand %p1226_p6, %p1223_p5 }
 0x7f2   :  { %1231 = shalt.err (!%p1228_p7)
}
 0x7f3   :  { %807 = dma.vmem_to_hbm [thread:$0]  %s805_s3, 128, %s1494_s6, [#allocation3]  }
 0x7f4   :  { %1232 = dma.done.wait [#allocation3], 128  }
 0x7f5   :  { %1233 = vsyncadd [#allocation3], 4294967168 }
 0x7f6   :  { %811 = vsyncpa [#allocation3], 1 }

</bundles_post_ra>
